<compile_context>
chip_gen: v6e
topology: v6e:2x2x1
jax: 0.10.0
libtpu: 0.0.40
codegen_flags: <defaults>
</compile_context>

<pallas_src>
import functools

import jax
import jax.numpy as jnp
from jax.experimental import pallas as pl
from jax.experimental.pallas import tpu as pltpu

_LANES = 128                           # batch elems packed on the lane axis (lane-dense output)
_GRANULE = 8                           # sublane granularity for batch-row blocks
_CHUNK_ROWS = 32                       # in-kernel chunk (sublane rows) per unrolled loop step
_VMEM_BUF_BYTES = 12 * 1024 * 1024     # per input pipeline buffer (x2 for double buffering)
_VMEM_LIMIT_BYTES = 48 * 1024 * 1024   # scoped VMEM limit; safe under v7x's 64 MiB physical


def _fraud_detector_kernel(x_ref, w_ref, b_ref, o_ref, *, dim, chunk, n_chunks):
    """x_ref: (block_rows, 128, D) input tile (native dtype, lane-padded to 128)
       w_ref: (1, D)  f32 weight row, VMEM-resident across the whole grid
       b_ref: (1,)    f32 bias scalar in SMEM
       o_ref: (block_rows, 128) lane-dense f32 output tile
    """
    w = w_ref[...].reshape(1, 1, dim)       # leading-dim reshape only: layout-free
    b = b_ref[0]                            # bias scalar from SMEM

    def compute(row0, rows):
        # In-register cast to f32 (mirrors x.float()); HBM traffic stays in the
        # input dtype.  VPU multiply + lane reduce instead of an N=1 MXU matmul.
        x = x_ref[pl.ds(row0, rows), :, :].astype(jnp.float32)
        z = jnp.sum(x * w, axis=-1) + b     # (rows, 128) f32 accumulate
        o_ref[pl.ds(row0, rows), :] = jax.nn.sigmoid(z)

    if n_chunks == 1:
        compute(0, chunk)
    else:
        # Chunk the body so large blocks never materialise whole-block f32
        # temporaries (keeps the kernel DMA-bound instead of spill/store-bound).
        def body(c, carry):
            compute(pl.multiple_of(c * chunk, chunk), chunk)
            return carry

        jax.lax.fori_loop(0, n_chunks, body, 0, unroll=True)


def fraud_detector_forward(x, weight, bias, *, vmem_buffer_bytes=_VMEM_BUF_BYTES):
    """Forward of FraudDetector: sigmoid(x.float() @ weight.T + bias).

    x: (B, D) float dtype (f32 or bf16); weight: (1, D) as in nn.Linear(D, 1);
    bias: (1,).  Returns (B, 1) float32.
    """
    B, D = x.shape
    x_isz = jnp.dtype(x.dtype).itemsize

    # --- batch packing: (B, D) -> (rows, 128, D) so the output tile is
    # lane-dense (rows, 128).  Pad only up to a multiple of 128 (copy happens
    # only for ragged batches); remaining raggedness vs. block_rows is handled
    # by Pallas' masked boundary blocks, so no padded rows are read from HBM.
    rows = pl.cdiv(B, _LANES)
    b128 = rows * _LANES
    if b128 != B:
        x = jnp.pad(x, ((0, b128 - B), (0, 0)))
    x3 = x.reshape(rows, _LANES, D)

    # --- block sizing from a VMEM budget that accounts for the lane padding
    # of the (.., 128, D) tile (D rounds up to a multiple of 128 in VMEM).
    # ~12 MiB per buffer, double-buffered, stays well under the 48 MiB scoped
    # limit on all of v5e / v6e / v7x.
    d_pad = pl.cdiv(D, _LANES) * _LANES
    budget_rows = max(
        _GRANULE,
        (vmem_buffer_bytes // (_LANES * d_pad * x_isz)) // _GRANULE * _GRANULE,
    )
    # Keep >= 4 grid steps when there is enough data: v7x shards the parallel
    # batch axis across 2 TensorCores and double-buffering needs overlap.
    n_steps_min = 4 if rows >= 4 * _GRANULE else 1
    n_steps = max(pl.cdiv(rows, budget_rows), n_steps_min)
    if n_steps == 1:
        block_rows = rows                   # block == full array: always legal
    else:
        block_rows = pl.cdiv(pl.cdiv(rows, n_steps), _GRANULE) * _GRANULE
        n_steps = pl.cdiv(rows, block_rows)  # last block is masked, not padded

    chunk = min(_CHUNK_ROWS, block_rows)
    while block_rows % chunk:               # chunk must divide block_rows
        chunk //= 2
    n_chunks = block_rows // chunk

    w = weight.reshape(1, D).astype(jnp.float32)
    b = bias.reshape(1).astype(jnp.float32)

    kernel = functools.partial(
        _fraud_detector_kernel, dim=D, chunk=chunk, n_chunks=n_chunks
    )

    cost = pl.CostEstimate(
        flops=2 * B * D + 4 * B,
        transcendentals=B,                                   # exp inside sigmoid
        bytes_accessed=B * D * x_isz + B * 4 + D * 4,
    )

    out = pl.pallas_call(
        kernel,
        out_shape=jax.ShapeDtypeStruct((rows, _LANES), jnp.float32),
        grid_spec=pl.GridSpec(
            grid=(n_steps,),
            in_specs=[
                # Batch-tiled, double-buffered multi-MiB input stream.
                pl.BlockSpec((block_rows, _LANES, D), lambda i: (i, 0, 0)),
                # Weight row stays resident in VMEM (constant block index).
                pl.BlockSpec((1, D), lambda i: (0, 0)),
                # Bias is a true scalar: SMEM, not a padded (8,128) VMEM tile.
                pl.BlockSpec(memory_space=pltpu.MemorySpace.SMEM),
            ],
            out_specs=pl.BlockSpec((block_rows, _LANES), lambda i: (i, 0)),
        ),
        compiler_params=pltpu.CompilerParams(
            dimension_semantics=("parallel",),
            vmem_limit_bytes=_VMEM_LIMIT_BYTES,
        ),
        cost_estimate=cost,
    )(x3, w, b)

    return out.reshape(b128, 1)[:B]


if __name__ == "__main__":
    key = jax.random.PRNGKey(0)
    k_x, k_w, k_b = jax.random.split(key, 3)

    batch, input_size = 8, 32
    x = jax.random.normal(k_x, (batch, input_size), dtype=jnp.float32)

    # Deterministic PyTorch-style init (uniform bound 1/sqrt(fan_in)).
    bound = 1.0 / (input_size ** 0.5)
    weight = jax.random.uniform(k_w, (1, input_size), jnp.float32, -bound, bound)
    bias = jax.random.uniform(k_b, (1,), jnp.float32, -bound, bound)

    out = fraud_detector_forward(x, weight, bias)
    jax.block_until_ready(out)

    # Cross-check against plain JAX reference.
    ref = jax.nn.sigmoid(x @ weight.T + bias)
    assert out.shape == (batch, 1)
    assert jnp.allclose(out, ref, atol=1e-5, rtol=1e-5)

    print("KERNEL_OK")
</pallas_src>

<mosaic_0001>
module attributes {stable_mosaic.version = 11 : i64} {
  func.func @_fraud_detector_kernel(%arg0: i32, %arg1: memref<1x128x32xf32, #tpu.memory_space<vmem>>, %arg2: memref<1x32xf32, #tpu.memory_space<vmem>>, %arg3: memref<1xf32, #tpu.memory_space<smem>>, %arg4: memref<1x128xf32, #tpu.memory_space<vmem>>) attributes {dimension_semantics = [#tpu.dimension_semantics<parallel>], iteration_bounds = array<i64: 1>, scalar_prefetch = 0 : i64, scratch_operands = 0 : i64, tpu.core_type = #tpu.core_type<tc>, window_params = [{transform_indices = @transform_0, window_bounds = array<i64: 1, 128, 32>}, {pipeline_mode = #tpu.pipeline_mode<synchronous>, transform_indices = @transform_1, window_bounds = array<i64: 1, 32>}, {transform_indices = @transform_2, window_bounds = array<i64: 1>}, {transform_indices = @transform_3, window_bounds = array<i64: 1, 128>}]} {
    %c0 = arith.constant 0 : index
    %c0_0 = arith.constant 0 : index
    %0 = vector.load %arg2[%c0, %c0_0] : memref<1x32xf32, #tpu.memory_space<vmem>>, vector<1x32xf32>
    %1 = vector.shape_cast %0 : vector<1x32xf32> to vector<1x1x32xf32>
    %c0_1 = arith.constant 0 : index
    %2 = memref.load %arg3[%c0_1] : memref<1xf32, #tpu.memory_space<smem>>
    %c0_2 = arith.constant 0 : index
    %c0_3 = arith.constant 0 : index
    %c0_4 = arith.constant 0 : index
    %3 = vector.load %arg1[%c0_2, %c0_3, %c0_4] : memref<1x128x32xf32, #tpu.memory_space<vmem>>, vector<1x128x32xf32>
    %4 = vector.broadcast %1 : vector<1x1x32xf32> to vector<1x128x32xf32>
    %5 = arith.mulf %3, %4 : vector<1x128x32xf32>
    %cst = arith.constant dense<0.000000e+00> : vector<1x128xf32>
    %6 = vector.multi_reduction <add>, %5, %cst [2] : vector<1x128x32xf32> to vector<1x128xf32>
    %7 = vector.broadcast %2 : f32 to vector<1x128xf32>
    %8 = arith.addf %6, %7 : vector<1x128xf32>
    %9 = arith.negf %8 : vector<1x128xf32>
    %10 = math.exp %9 : vector<1x128xf32>
    %cst_5 = arith.constant 1.000000e+00 : f32
    %11 = vector.broadcast %cst_5 : f32 to vector<1x128xf32>
    %12 = arith.addf %11, %10 : vector<1x128xf32>
    %13 = arith.divf %11, %12 : vector<1x128xf32>
    %c0_6 = arith.constant 0 : index
    %c0_7 = arith.constant 0 : index
    %14 = vector.load %arg4[%c0_6, %c0_7] : memref<1x128xf32, #tpu.memory_space<vmem>>, vector<1x128xf32>
    tpu.vector_store %arg4[%c0_6, %c0_7], %13 {strides = array<i32>} : memref<1x128xf32, #tpu.memory_space<vmem>>, vector<1x128xf32>,
    return
  }
  func.func @transform_0(%arg0: i32) -> (i32, i32, i32) {
    %c0_i32 = arith.constant 0 : i32
    %c0_i32_0 = arith.constant 0 : i32
    %c0_i32_1 = arith.constant 0 : i32
    return %arg0, %c0_i32, %c0_i32_0 : i32, i32, i32
  }
  func.func @transform_1(%arg0: i32) -> (i32, i32) {
    %c0_i32 = arith.constant 0 : i32
    %c0_i32_0 = arith.constant 0 : i32
    %c0_i32_1 = arith.constant 0 : i32
    return %c0_i32, %c0_i32_0 : i32, i32
  }
  func.func @transform_2(%arg0: i32) -> i32 {
    %c0_i32 = arith.constant 0 : i32
    %c0_i32_0 = arith.constant 0 : i32
    return %c0_i32 : i32
  }
  func.func @transform_3(%arg0: i32) -> (i32, i32) {
    %c0_i32 = arith.constant 0 : i32
    %c0_i32_0 = arith.constant 0 : i32
    return %arg0, %c0_i32 : i32, i32
  }
}

</mosaic_0001>

<bundles_post_ra>
// kernel: tpu_custom_call.1
= control target key start
LH: loop header
LB: loop body
LE: loop exit
PB: predicated region body
PF: predicated region fallthrough
CT: control target
= control target key end

     0   :  { %vm56_vm0 = vcmask 261120   ;;  %s615_s0 = inlined_call_operand.vmem [shape: f32[1,128,32], index: 0, kind: input, shape index: {}]   ;;  %s616_s1 = inlined_call_operand.vmem [shape: f32[1,32], index: 1, kind: input, shape index: {}]   ;;  %s617_s2 = inlined_call_operand.<no memory space> [shape: f32[1], index: 2, kind: input, shape index: {}]   ;;  %s618_s3 = inlined_call_operand.hbm [shape: f32[1,128], index: 3, kind: output, shape index: {}]  }
   0x1   :  { %v361_v0 = vld [vmem:[%s616_s1] ss:$0 sm:$0xff]  ;;  %v20_v2 = vld [vmem:[%s615_s0 + $0x10] sm:$0xff]  ;;  %v19_v5 = vld [vmem:[%s615_s0 + $0x8] sm:$0xff] }
   0x2   :  { %v18_v1 = vld [vmem:[%s615_s0] sm:$0xff]  ;;  %v42_v4 = vmul.f32 %v361_v0, %v20_v2  ;;  %v21_v6 = vld [vmem:[%s615_s0 + $0x18] sm:$0xff]  ;;  %v41_v7 = vmul.f32 %v361_v0, %v19_v5  ;;  %v23_v10 = vld [vmem:[%s615_s0 + $0x28] sm:$0xff] }
   0x3   :  { %v40_v3 = vmul.f32 %v361_v0, %v18_v1  ;;  %v43_v8 = vmul.f32 %v361_v0, %v21_v6  ;;  %v22_v9 = vld [vmem:[%s615_s0 + $0x20] sm:$0xff]  ;;  %v45_v16 = vmul.f32 %v361_v0, %v23_v10 }
   0x4   :  { %v63_v12 = vsel %vm56_vm0, %v42_v4, 0.0  ;;  %v60_v13 = vsel %vm56_vm0, %v41_v7, 0.0  ;;  %v44_v15 = vmul.f32 %v361_v0, %v22_v9 }
   0x5   :  { %v57_v11 = vsel %vm56_vm0, %v40_v3, 0.0  ;;  %64 = vadd.xlane.f32.xlu1 %v63_v12  ;;  %v66_v14 = vsel %vm56_vm0, %v43_v8, 0.0 }
   0x6   :  { %58 = vadd.xlane.f32.xlu0 %v57_v11 }
   0x7   :  { %9 = vsyncpa [#allocation4], 0  ;;  %v24_v17 = vld [vmem:[%s615_s0 + $0x30] sm:$0xff]  ;;  %v25_v18 = vld [vmem:[%s615_s0 + $0x38] sm:$0xff]  ;;  %v69_v19 = vsel %vm56_vm0, %v44_v15, 0.0  ;;  %v72_v20 = vsel %vm56_vm0, %v45_v16, 0.0  ;;  %v556_v49 = vstv %s617_s2 }
   0x8   :  { %v46_v21 = vmul.f32 %v361_v0, %v24_v17  ;;  %v47_v22 = vmul.f32 %v361_v0, %v25_v18  ;;  %v26_v23 = vld [vmem:[%s615_s0 + $0x40] sm:$0xff]  ;;  %v27_v24 = vld [vmem:[%s615_s0 + $0x48] sm:$0xff]  ;;  %v28_v29 = vld [vmem:[%s615_s0 + $0x50] sm:$0xff]  ;;  %vm245_vm1 = vcmask 130112   ;;  %vm252_vm2 = vcmask 195712  }
   0x9   :  { %67 = vadd.xlane.f32.xlu1 %v66_v14  ;;  %v48_v27 = vmul.f32 %v361_v0, %v26_v23  ;;  %v49_v28 = vmul.f32 %v361_v0, %v27_v24  ;;  %v29_v30 = vld [vmem:[%s615_s0 + $0x58] sm:$0xff]  ;;  %v50_v33 = vmul.f32 %v361_v0, %v28_v29  ;;  %v30_v35 = vld [vmem:[%s615_s0 + $0x60] sm:$0xff]  ;;  %v31_v36 = vld [vmem:[%s615_s0 + $0x68] sm:$0xff]  ;;  %vm259_vm3 = vcmask 261312  }
   0xa   :  { %61 = vadd.xlane.f32.xlu0 %v60_v13  ;;  %v75_v25 = vsel %vm56_vm0, %v46_v21, 0.0  ;;  %v78_v26 = vsel %vm56_vm0, %v47_v22, 0.0  ;;  %v51_v34 = vmul.f32 %v361_v0, %v29_v30  ;;  %v52_v39 = vmul.f32 %v361_v0, %v30_v35  ;;  %v32_v41 = vld [vmem:[%s615_s0 + $0x70] sm:$0xff]  ;;  %v33_v42 = vld [vmem:[%s615_s0 + $0x78] sm:$0xff]  ;;  %s465_s0 = smov [#allocation3]  }
   0xb   :  { %v81_v31 = vsel %vm56_vm0, %v48_v27, 0.0  ;;  %v84_v32 = vsel %vm56_vm0, %v49_v28, 0.0  ;;  %v87_v37 = vsel %vm56_vm0, %v50_v33, 0.0  ;;  %v53_v40 = vmul.f32 %v361_v0, %v31_v36  ;;  %s353_s2 = sshll.u32 %s465_s0, 4  ;;  %s354_s2 = int_to_ptr.vmem [resolvable:$true] %s353_s2 }
   0xc   :  { %v90_v38 = vsel %vm56_vm0, %v51_v34, 0.0  ;;  %v93_v43 = vsel %vm56_vm0, %v52_v39, 0.0  ;;  %v54_v45 = vmul.f32 %v361_v0, %v32_v41  ;;  %v55_v46 = vmul.f32 %v361_v0, %v33_v42  ;;  %s443_s20 = scalar_lea.vmem %s354_s2, 16  ;;  %s447_s21 = scalar_lea.vmem %s354_s2, 32 }
   0xd   :  { %73 = vadd.xlane.f32.xlu1 %v72_v20  ;;  %v96_v44 = vsel %vm56_vm0, %v53_v40, 0.0  ;;  %vm266_vm4 = vcmask 326912   ;;  %vm273_vm5 = vcmask 392512   ;;  %vm280_vm6 = vcmask 458112   ;;  %p444_p0 = scmp.ne.s32.totalorder %s354_s2, %s443_s20  ;;  %p448_p1 = scmp.lt.s32.totalorder %s354_s2, %s354_s2 }
   0xe   :  { %70 = vadd.xlane.f32.xlu0 %v69_v19  ;;  %v99_v47 = vsel %vm56_vm0, %v54_v45, 0.0  ;;  %v102_v48 = vsel %vm56_vm0, %v55_v46, 0.0  ;;  %vm287_vm7 = vcmask 523712   ;;  %vm294_vm8 = vcmask 589312   ;;  %p449_p2 = scmp.lt.s32.totalorder %s447_s21, %s443_s20 }
   0xf   :  { %vm301_vm9 = vcmask 654912   ;;  %vm308_vm10 = vcmask 720512   ;;  %vm315_vm11 = vcmask 786112   ;;  %vm322_vm12 = vcmask 851712  }
  0x10   :  { %vm329_vm13 = vcmask 917312   ;;  %vm336_vm14 = vcmask 982912   ;;  %vm343_vm15 = vcmask 1048512   ;;  %p450_p3 = por %p449_p2, %p448_p1 }
  0x11   :  { %79 = vadd.xlane.f32.xlu1 %v78_v26 }
  0x12   :  { %76 = vadd.xlane.f32.xlu0 %v75_v25  ;;  %v234_v25 = vlaneseq  ;;  %p451_p4 = pnand %p450_p3, %p444_p0 }
  0x14   :  { %v572_v36 = vand.u32 127, %v234_v25 }
  0x15   :  { %85 = vadd.xlane.f32.xlu1 %v84_v32 }
  0x16   :  { %82 = vadd.xlane.f32.xlu0 %v81_v31 }
  0x19   :  { %91 = vadd.xlane.f32.xlu1 %v90_v38 }
  0x1a   :  { %88 = vadd.xlane.f32.xlu0 %v87_v37 }
  0x1d   :  { %97 = vadd.xlane.f32.xlu1 %v96_v44 }
  0x1e   :  { %94 = vadd.xlane.f32.xlu0 %v93_v43 }
  0x21   :  { %103 = vadd.xlane.f32.xlu1 %v102_v48  ;;  %v247_v48 = vadd.s32 4294967280, %v572_v36 }
  0x22   :  { %100 = vadd.xlane.f32.xlu0 %v99_v47  ;;  %v576_v47 = vshrl.u32 %v234_v25, 7 }
  0x8e   :  { %v65_v51 = vpop.xlane.xlu1 %64 }
  0x8f   :  { %v59_v50 = vpop.xlane.xlu0 %58  ;;  %v108_v53 = vadd.f32 %v556_v49, %v65_v51  ;;  %v240_v51 = vadd.s32 4294967288, %v572_v36 }
  0x90   :  { %v106_v52 = vadd.f32 %v556_v49, %v59_v50 }
  0x91   :  { %v364_v55 = vmul.f32 -1.442695, %v108_v53 }
  0x92   :  { %v362_v54 = vmul.f32 -1.442695, %v106_v52  ;;  %v68_v57 = vpop.xlane.xlu1 %67 }
  0x93   :  { %v62_v56 = vpop.xlane.xlu0 %61  ;;  %v109_v59 = vadd.f32 %v556_v49, %v68_v57 }
  0x94   :  { %379 = vpow2.f32 %v362_v54  ;;  %v107_v58 = vadd.f32 %v556_v49, %v62_v56  ;;  %v254_v54 = vadd.s32 4294967272, %v572_v36 }
  0x95   :  { %381 = vpow2.f32 %v364_v55  ;;  %v365_v61 = vmul.f32 -1.442695, %v109_v59  ;;  %v238_v59 = vsub.s32 %v572_v36, %v576_v47 }
  0x96   :  { %v363_v60 = vmul.f32 -1.442695, %v107_v58  ;;  %v74_v63 = vpop.xlane.xlu1 %73 }
  0x97   :  { %v71_v62 = vpop.xlane.xlu0 %70  ;;  %v111_v1 = vadd.f32 %v556_v49, %v74_v63  ;;  %v257_v63 = vsub.s32 %v254_v54, %v576_v47 }
  0x98   :  { %383 = vpow2.f32 %v363_v60  ;;  %v110_v0 = vadd.f32 %v556_v49, %v71_v62  ;;  %v243_v60 = vsub.s32 %v240_v51, %v576_v47  ;;  %v250_v62 = vsub.s32 %v247_v48, %v576_v47 }
  0x99   :  { %385 = vpow2.f32 %v365_v61  ;;  %v367_v3 = vmul.f32 -1.442695, %v111_v1  ;;  %v310_v48 = vadd.s32 4294967208, %v572_v36 }
  0x9a   :  { %v366_v2 = vmul.f32 -1.442695, %v110_v0  ;;  %v80_v5 = vpop.xlane.xlu1 %79 }
  0x9b   :  { %v77_v4 = vpop.xlane.xlu0 %76  ;;  %v113_v7 = vadd.f32 %v556_v49, %v80_v5 }
  0x9c   :  { %387 = vpow2.f32 %v366_v2  ;;  %v112_v6 = vadd.f32 %v556_v49, %v77_v4  ;;  %v268_v4 = vadd.s32 4294967256, %v572_v36 }
  0x9d   :  { %389 = vpow2.f32 %v367_v3  ;;  %v369_v9 = vmul.f32 -1.442695, %v113_v7 }
  0x9e   :  { %v368_v8 = vmul.f32 -1.442695, %v112_v6  ;;  %v86_v11 = vpop.xlane.xlu1 %85 }
  0x9f   :  { %v83_v10 = vpop.xlane.xlu0 %82  ;;  %v115_v13 = vadd.f32 %v556_v49, %v86_v11 }
  0xa0   :  { %391 = vpow2.f32 %v368_v8  ;;  %v114_v12 = vadd.f32 %v556_v49, %v83_v10 }
  0xa1   :  { %v380_v14 = vpop.eup %379  ;;  %393 = vpow2.f32 %v369_v9  ;;  %v371_v19 = vmul.f32 -1.442695, %v115_v13  ;;  %v275_v9 = vadd.s32 4294967248, %v572_v36 }
  0xa2   :  { %v382_v15 = vpop.eup %381  ;;  %v170_v16 = vadd.f32 1.0, %v380_v14  ;;  %v370_v17 = vmul.f32 -1.442695, %v114_v12  ;;  %v92_v21 = vpop.xlane.xlu1 %91 }
  0xa3   :  { %v172_v18 = vadd.f32 1.0, %v382_v15  ;;  %v89_v20 = vpop.xlane.xlu0 %88  ;;  %v117_v23 = vadd.f32 %v556_v49, %v92_v21 }
  0xa4   :  { %395 = vrcp.f32 %v170_v16  ;;  %v116_v22 = vadd.f32 %v556_v49, %v89_v20 }
  0xa5   :  { %v384_v24 = vpop.eup %383  ;;  %397 = vrcp.f32 %v172_v18  ;;  %v373_v30 = vmul.f32 -1.442695, %v117_v23  ;;  %v271_v18 = vsub.s32 %v268_v4, %v576_v47  ;;  %v278_v23 = vsub.s32 %v275_v9, %v576_v47 }
  0xa6   :  { %v386_v26 = vpop.eup %385  ;;  %v171_v27 = vadd.f32 1.0, %v384_v24  ;;  %399 = vpow2.f32 %v370_v17  ;;  %v372_v28 = vmul.f32 -1.442695, %v116_v22  ;;  %v98_v32 = vpop.xlane.xlu1 %97  ;;  %v338_v4 = vadd.s32 4294967176, %v572_v36 }
  0xa7   :  { %v173_v29 = vadd.f32 1.0, %v386_v26  ;;  %401 = vpow2.f32 %v371_v19  ;;  %v95_v31 = vpop.xlane.xlu0 %94  ;;  %v119_v34 = vadd.f32 %v556_v49, %v98_v32  ;;  %v282_v19 = vadd.s32 4294967240, %v572_v36 }
  0xa8   :  { %403 = vrcp.f32 %v171_v27  ;;  %v118_v33 = vadd.f32 %v556_v49, %v95_v31  ;;  %v289_v27 = vadd.s32 4294967232, %v572_v36 }
  0xa9   :  { %v388_v35 = vpop.eup %387  ;;  %405 = vrcp.f32 %v173_v29  ;;  %v375_v41 = vmul.f32 -1.442695, %v119_v34  ;;  %v285_v32 = vsub.s32 %v282_v19, %v576_v47 }
  0xaa   :  { %v390_v37 = vpop.eup %389  ;;  %v174_v38 = vadd.f32 1.0, %v388_v35  ;;  %407 = vpow2.f32 %v372_v28  ;;  %v374_v39 = vmul.f32 -1.442695, %v118_v33  ;;  %v104_v43 = vpop.xlane.xlu1 %103  ;;  %v296_v28 = vadd.s32 4294967224, %v572_v36 }
  0xab   :  { %v175_v40 = vadd.f32 1.0, %v390_v37  ;;  %409 = vpow2.f32 %v373_v30  ;;  %v101_v42 = vpop.xlane.xlu0 %100  ;;  %v121_v45 = vadd.f32 %v556_v49, %v104_v43  ;;  %v303_v43 = vadd.s32 4294967216, %v572_v36 }
  0xac   :  { %411 = vrcp.f32 %v174_v38  ;;  %v120_v44 = vadd.f32 %v556_v49, %v101_v42  ;;  %v261_v49 = vadd.s32 4294967264, %v572_v36 }
  0xad   :  { %v392_v46 = vpop.eup %391  ;;  %413 = vrcp.f32 %v175_v40  ;;  %v377_v56 = vmul.f32 -1.442695, %v121_v45  ;;  %v292_v40 = vsub.s32 %v289_v27, %v576_v47  ;;  %v306_v54 = vsub.s32 %v303_v43, %v576_v47 }
  0xae   :  { %v394_v50 = vpop.eup %393  ;;  %v176_v52 = vadd.f32 1.0, %v392_v46  ;;  %415 = vpow2.f32 %v374_v39  ;;  %v376_v53 = vmul.f32 -1.442695, %v120_v44  ;;  %v264_v3 = vsub.s32 %v261_v49, %v576_v47 }
  0xaf   :  { %v177_v55 = vadd.f32 1.0, %v394_v50  ;;  %417 = vpow2.f32 %v375_v41  ;;  %v299_v41 = vsub.s32 %v296_v28, %v576_v47  ;;  %v313_v49 = vsub.s32 %v310_v48, %v576_v47 }
  0xb0   :  { %419 = vrcp.f32 %v176_v52 }
  0xb1   :  { %v396_v57 = vpop.eup %395  ;;  %421 = vrcp.f32 %v177_v55  ;;  %v317_v55 = vadd.s32 4294967200, %v572_v36 }
  0xb2   :  { %v398_v58 = vpop.eup %397  ;;  %423 = vpow2.f32 %v376_v53  ;;  %v239_v7 = vrot.slane %v396_v57, %v238_v59 }
  0xb3   :  { %v400_v61 = vpop.eup %399  ;;  %425 = vpow2.f32 %v377_v56  ;;  %v251_v11 = vrot.slane %v398_v58, %v250_v62  ;;  %v324_v58 = vadd.s32 4294967192, %v572_v36 }
  0xb4   :  { %v402_v0 = vpop.eup %401  ;;  %v178_v1 = vadd.f32 1.0, %v400_v61 }
  0xb5   :  { %v404_v2 = vpop.eup %403  ;;  %v179_v5 = vadd.f32 1.0, %v402_v0  ;;  %v331_v0 = vadd.s32 4294967184, %v572_v36 }
  0xb6   :  { %v406_v6 = vpop.eup %405  ;;  %v244_v8 = vrot.slane %v404_v2, %v243_v60  ;;  %427 = vrcp.f32 %v178_v1 }
  0xb7   :  { %v408_v10 = vpop.eup %407  ;;  %v258_v12 = vrot.slane %v406_v6, %v257_v63  ;;  %429 = vrcp.f32 %v179_v5  ;;  %v320_v63 = vsub.s32 %v317_v55, %v576_v47  ;;  %v334_v9 = vsub.s32 %v331_v0, %v576_v47 }
  0xb8   :  { %v410_v13 = vpop.eup %409  ;;  %v246_v14 = vsel %vm245_vm1, %v244_v8, %v239_v7  ;;  %v180_v15 = vadd.f32 1.0, %v408_v10 }
  0xb9   :  { %v412_v16 = vpop.eup %411  ;;  %v253_v17 = vsel %vm252_vm2, %v251_v11, %v246_v14  ;;  %v181_v20 = vadd.f32 1.0, %v410_v13 }
  0xba   :  { %v414_v21 = vpop.eup %413  ;;  %v265_v22 = vrot.slane %v412_v16, %v264_v3  ;;  %431 = vrcp.f32 %v180_v15  ;;  %v260_v25 = vsel %vm259_vm3, %v258_v12, %v253_v17  ;;  %v327_v3 = vsub.s32 %v324_v58, %v576_v47 }
  0xbb   :  { %v416_v24 = vpop.eup %415  ;;  %433 = vrcp.f32 %v181_v20  ;;  %v272_v31 = vrot.slane %v414_v21, %v271_v18  ;;  %v341_v12 = vsub.s32 %v338_v4, %v576_v47 }
  0xbc   :  { %v418_v26 = vpop.eup %417  ;;  %v182_v29 = vadd.f32 1.0, %v416_v24  ;;  %v267_v35 = vsel %vm266_vm4, %v265_v22, %v260_v25 }
  0xbd   :  { %v420_v30 = vpop.eup %419  ;;  %v183_v33 = vadd.f32 1.0, %v418_v26  ;;  %v274_v44 = vsel %vm273_vm5, %v272_v31, %v267_v35 }
  0xbe   :  { %v422_v34 = vpop.eup %421  ;;  %v279_v37 = vrot.slane %v420_v30, %v278_v23  ;;  %435 = vrcp.f32 %v182_v29 }
  0xbf   :  { %v424_v38 = vpop.eup %423  ;;  %437 = vrcp.f32 %v183_v33  ;;  %v286_v45 = vrot.slane %v422_v34, %v285_v32 }
  0xc0   :  { %v426_v39 = vpop.eup %425  ;;  %v184_v42 = vadd.f32 1.0, %v424_v38  ;;  %v281_v50 = vsel %vm280_vm6, %v279_v37, %v274_v44 }
  0xc1   :  { %v185_v46 = vadd.f32 1.0, %v426_v39  ;;  %v288_v57 = vsel %vm287_vm7, %v286_v45, %v281_v50 }
  0xc2   :  { %439 = vrcp.f32 %v184_v42 }
  0xc3   :  { %v428_v51 = vpop.eup %427  ;;  %441 = vrcp.f32 %v185_v46 }
  0xc4   :  { %v430_v52 = vpop.eup %429  ;;  %v293_v53 = vrot.slane %v428_v51, %v292_v40 }
  0xc5   :  { %v300_v56 = vrot.slane %v430_v52, %v299_v41 }
  0xc6   :  { %v295_v59 = vsel %vm294_vm8, %v293_v53, %v288_v57 }
  0xc7   :  { %v432_v60 = vpop.eup %431  ;;  %v302_v1 = vsel %vm301_vm9, %v300_v56, %v295_v59 }
  0xc8   :  { %v434_v61 = vpop.eup %433  ;;  %v307_v62 = vrot.slane %v432_v60, %v306_v54 }
  0xc9   :  { %v314_v2 = vrot.slane %v434_v61, %v313_v49 }
  0xca   :  { %v309_v5 = vsel %vm308_vm10, %v307_v62, %v302_v1 }
  0xcb   :  { %v436_v6 = vpop.eup %435  ;;  %v316_v10 = vsel %vm315_vm11, %v314_v2, %v309_v5 }
  0xcc   :  { %v438_v7 = vpop.eup %437  ;;  %v321_v8 = vrot.slane %v436_v6, %v320_v63 }
  0xcd   :  { %v328_v11 = vrot.slane %v438_v7, %v327_v3 }
  0xce   :  { %v323_v13 = vsel %vm322_vm12, %v321_v8, %v316_v10 }
  0xcf   :  { %v440_v14 = vpop.eup %439  ;;  %v330_v16 = vsel %vm329_vm13, %v328_v11, %v323_v13 }
  0xd0   :  { %v442_v15 = vpop.eup %441  ;;  %v335_v36 = vrot.slane %v440_v14, %v334_v9 }
  0xd1   :  { %v342_v17 = vrot.slane %v442_v15, %v341_v12 }
  0xd2   :  { %v337_v18 = vsel %vm336_vm14, %v335_v36, %v330_v16 }
  0xd3   :  { %v344_v19 = vsel %vm343_vm15, %v342_v17, %v337_v18 }
  0xd4   :  { %346 = vst [vmem:[#allocation3] sm:$0x1] %v344_v19 }
  0xd5   :  { %454 = shalt.err (!%p451_p4)
}
  0xd6   :  { %356 = dma.vmem_to_hbm [thread:$0]  %s354_s2, 16, %s618_s3, [#allocation4]  }
  0xd7   :  { %463 = dma.done.wait [#allocation4], 16  }
  0xd8   :  { %464 = vsyncadd [#allocation4], 4294967280 }
  0xd9   :  { %360 = vsyncpa [#allocation4], 1 }

</bundles_post_ra>
